<compile_context>
chip_gen: v5e
topology: v5e:2x2
jax: 0.10.0
libtpu: 0.0.40
codegen_flags: <defaults>
</compile_context>

<pallas_src>
import functools

import jax
import jax.numpy as jnp
from jax.experimental import pallas as pl
from jax.experimental.pallas import tpu as pltpu

EPS32 = 1e-4  # geoopt EPS[torch.float32]


def _sort_columns_ascending(t, rows):
    """Bitonic sorting network along axis 0 of a (rows, L) tile.

    `rows` must be a power of two.  Each compare-exchange stage works on the
    whole tile: the partner row (i ^ j) is fetched with a sublane rotation
    (pltpu.roll, result[i] = t[(i - shift) % rows], i.e. jnp.roll semantics),
    and the keep-min / keep-max decision is a compile-time sublane mask.
    """
    assert rows & (rows - 1) == 0 and rows >= 2
    lanes = t.shape[1]
    ridx = jax.lax.broadcasted_iota(jnp.int32, (rows, lanes), 0)
    k = 2
    while k <= rows:
        j = k // 2
        while j >= 1:
            # partner of row i is row i ^ j  (never crosses the tile for the
            # selected branch, so the roll wraparound is harmless).
            if 2 * j == rows:
                partner = pltpu.roll(t, j, axis=0)               # i ^ j == (i +- j) mod rows
            else:
                upper = (ridx & j) != 0                          # partner sits at i - j
                partner = jnp.where(
                    upper,
                    pltpu.roll(t, j, axis=0),                    # [i] = t[i - j]
                    pltpu.roll(t, rows - j, axis=0))             # [i] = t[i + j]
            # keep min iff bit_j(i) == bit_k(i)  (ascending/descending blocks)
            m = ridx & (j + k)
            take_min = (m == 0) | (m == j + k)
            t = jnp.where(take_min, jnp.minimum(t, partner),
                          jnp.maximum(t, partner))
            j //= 2
        k *= 2
    return t


def _swd_kernel(tab_ref, o_ref, *, n, dim, nt, p, denom):
    ncol = nt * p
    r_pb = 0
    r_y = r_pb + dim
    r_in = r_y + 2 * n
    r_d = r_in + 2 * n
    r_ys = r_d + 2 * n
    r_xp = r_ys + 2 * n

    pbig = tab_ref[r_pb:r_pb + dim, 0:ncol]        # (D, nt*p)  proj_t[q, d] at col t*p+q
    y = tab_ref[r_y:r_y + 2 * n, 0:dim]            # (2n, D)    rows: random_samples then z
    innerL = tab_ref[r_in:r_in + 2 * n, 0:ncol]    # <x_t, y_i> at (i, t*p+q)
    dL = tab_ref[r_d:r_d + 2 * n, 0:ncol]          # acos(clip(<x_t, y_i>))
    ysqL = tab_ref[r_ys:r_ys + 2 * n, 0:ncol]      # ||y_i||^2 (row-broadcast)
    xp = tab_ref[r_xp:r_xp + 1, 0:ncol]            # <x_t, proj_t[q]>  (1, nt*p)

    # Projected sphere logmap, fully factored:
    #   g[i, t*p+q] = scale[t,i] * (<y_i, proj_tq> - inner[t,i] * <x_t, proj_tq>)
    # with ||u||^2 = ||y||^2 - inner^2 and scale = dist * rsqrt(||u||^2).
    yp = jnp.dot(y, pbig, preferred_element_type=jnp.float32)     # one MXU pass, (2n, nt*p)
    uu = jnp.maximum(ysqL - innerL * innerL, EPS32 * EPS32)
    scale = dL * jax.lax.rsqrt(uu)                                # EUP rsqrt, no divide/select
    g = scale * (yp - innerL * xp)                                # (2n, nt*p)

    # Sort each (tangent, projection) column over the batch axis; both halves
    # are independent (8, nt*p) tiles (rows 0:n = log_random, n:2n = log_sample).
    enc = _sort_columns_ascending(g[0:n, :], n)
    dst = _sort_columns_ascending(g[n:2 * n, :], n)
    diff = enc - dst
    tot = jnp.sum(diff * diff, axis=1, keepdims=True)             # (n, 1)
    tot = jnp.sum(tot, axis=0, keepdims=True)                     # (1, 1)
    o_ref[...] = tot * (1.0 / denom)


@functools.partial(jax.jit, static_argnums=(4,))
def representation_tangent_collapse(z, tangent_points, random_samples,
                                    projections, num_tangent_space):
    n, dim = z.shape
    nt = tangent_points.shape[0]
    p = projections.shape[1]
    ncol = nt * p
    # TODO(synk): non-power-of-two batch sizes would need +inf padding of the
    # sort groups; the module is exercised with n = 8 here.
    assert n & (n - 1) == 0, "batch size must be a power of two for the sort network"

    f32 = jnp.float32
    z = z.astype(f32)
    tp = tangent_points.astype(f32)
    rs = random_samples.astype(f32)
    pr = projections.astype(f32)

    # Tiny (nt, 2n) coefficient tables.  acos (geoopt sphere distance) has no
    # Mosaic lowering, so it is computed here and fused by XLA into the single
    # producer fusion that assembles the input slab.
    y_all = jnp.concatenate([rs, z], axis=0)                          # (2n, D)
    inner = tp @ y_all.T                                              # (nt, 2n)
    d = jnp.arccos(jnp.clip(inner, -1.0 + EPS32, 1.0 - EPS32))        # (nt, 2n)
    ysq = jnp.sum(y_all * y_all, axis=1)                              # (2n,)

    def lane_expand(a):          # (nt, 2n) -> (2n, nt*p); column t*p+q <- tangent t
        return jnp.repeat(a.T, p, axis=1)

    innerL = lane_expand(inner)
    dL = lane_expand(d)
    ysqL = jnp.broadcast_to(ysq[:, None], (2 * n, ncol))
    pbig = jnp.transpose(pr.reshape(nt * p, dim))                     # (D, nt*p)
    xp = jnp.einsum('td,tqd->tq', tp, pr).reshape(1, ncol)            # (1, nt*p)

    # One lane-dense f32 slab -> a single input DMA (~18 KiB for the test shapes).
    width = max(dim, ncol)

    def padw(a):
        return jnp.pad(a, ((0, 0), (0, width - a.shape[1])))

    slab = jnp.concatenate(
        [padw(pbig), padw(y_all), padw(innerL), padw(dL), padw(ysqL), padw(xp)],
        axis=0)                                                       # (D + 8n + 1, width)

    denom = float(n * p * num_tangent_space)
    kernel = functools.partial(_swd_kernel, n=n, dim=dim, nt=nt, p=p, denom=denom)

    out = pl.pallas_call(
        kernel,
        out_shape=jax.ShapeDtypeStruct((1, 1), jnp.float32),
        in_specs=[pl.BlockSpec(memory_space=pltpu.MemorySpace.VMEM)],
        out_specs=pl.BlockSpec(memory_space=pltpu.MemorySpace.VMEM),
        cost_estimate=pl.CostEstimate(
            flops=2 * (2 * n) * dim * ncol + 40 * (2 * n) * ncol,
            transcendentals=2 * n * ncol,
            bytes_accessed=slab.size * 4 + 4),
    )(slab)
    return out[0, 0]


def _reference(z, tangent_points, random_samples, projections, num_tangent_space):
    eps = EPS32

    def logmap(x, y):  # x: (D,), y: (N, D)   -- mirrors geoopt.Sphere.logmap
        u0 = y - x
        u = u0 - jnp.sum(x * u0, axis=-1, keepdims=True) * x
        dist = jnp.arccos(jnp.clip(jnp.sum(x * y, axis=-1, keepdims=True),
                                   -1.0 + eps, 1.0 - eps))
        nrm = jnp.maximum(jnp.sqrt(jnp.sum(u * u, axis=-1, keepdims=True)), eps)
        return jnp.where(dist > eps, u * dist / nrm, u)

    swd = 0.0
    for i in range(tangent_points.shape[0]):
        x = tangent_points[i]
        log_random = logmap(x, random_samples)
        log_sample = logmap(x, z)
        proj = projections[i]
        enc = log_random @ proj.T
        dst = log_sample @ proj.T
        wd = jnp.sort(enc.T, axis=1) - jnp.sort(dst.T, axis=1)
        swd = swd + jnp.mean(wd ** 2)
    return swd / num_tangent_space


if __name__ == "__main__":
    key = jax.random.PRNGKey(0)
    kz, kt, ks, kp = jax.random.split(key, 4)

    batch, dim, num_proj = 8, 32, 6       # z: (N, D); num_projections = 6
    num_tangent_space = batch             # torch loop runs over z.shape[0] tangent points

    def l2_normalize(x, eps=1e-12):       # F.normalize(p=2, dim=1)
        nrm = jnp.sqrt(jnp.sum(x * x, axis=1, keepdims=True))
        return x / jnp.maximum(nrm, eps)

    z = jax.random.normal(kz, (batch, dim), jnp.float32)
    tangent_points = l2_normalize(jax.random.normal(kt, (batch, dim), jnp.float32))
    random_samples = l2_normalize(jax.random.normal(ks, (batch, dim), jnp.float32))
    # fresh (P, D) Gaussian projection matrix per SWD call, as in the torch code
    projections = jax.random.normal(kp, (batch, num_proj, dim), jnp.float32)

    out = representation_tangent_collapse(
        z, tangent_points, random_samples, projections, num_tangent_space)
    out = jax.block_until_ready(out)

    ref = _reference(z, tangent_points, random_samples, projections,
                     num_tangent_space)
    assert jnp.isfinite(out), "kernel produced non-finite output"
    assert abs(float(out) - float(ref)) <= 1e-3 * max(1.0, abs(float(ref))), \
        f"mismatch: kernel={float(out)} ref={float(ref)}"

    print("KERNEL_OK")
</pallas_src>

<mosaic_0001>
module attributes {stable_mosaic.version = 11 : i64} {
  func.func @_swd_kernel(%arg0: memref<97x48xf32, #tpu.memory_space<vmem>>, %arg1: memref<1x1xf32, #tpu.memory_space<vmem>>) attributes {dimension_semantics = [], scalar_prefetch = 0 : i64, scratch_operands = 0 : i64, tpu.core_type = #tpu.core_type<tc>} {
    %c0 = arith.constant 0 : index
    %c0_0 = arith.constant 0 : index
    %0 = vector.load %arg0[%c0, %c0_0] : memref<97x48xf32, #tpu.memory_space<vmem>>, vector<32x48xf32>
    %c32 = arith.constant 32 : index
    %c0_1 = arith.constant 0 : index
    %1 = vector.load %arg0[%c32, %c0_1] : memref<97x48xf32, #tpu.memory_space<vmem>>, vector<16x32xf32>
    %c48 = arith.constant 48 : index
    %c0_2 = arith.constant 0 : index
    %2 = vector.load %arg0[%c48, %c0_2] : memref<97x48xf32, #tpu.memory_space<vmem>>, vector<16x48xf32>
    %c64 = arith.constant 64 : index
    %c0_3 = arith.constant 0 : index
    %3 = vector.load %arg0[%c64, %c0_3] : memref<97x48xf32, #tpu.memory_space<vmem>>, vector<16x48xf32>
    %c80 = arith.constant 80 : index
    %c0_4 = arith.constant 0 : index
    %4 = vector.load %arg0[%c80, %c0_4] : memref<97x48xf32, #tpu.memory_space<vmem>>, vector<16x48xf32>
    %c96 = arith.constant 96 : index
    %c0_5 = arith.constant 0 : index
    %5 = vector.load %arg0[%c96, %c0_5] : memref<97x48xf32, #tpu.memory_space<vmem>>, vector<1x48xf32>
    %cst = arith.constant dense<0.000000e+00> : vector<16x48xf32>
    %6 = tpu.matmul %1, %0, %cst {dimension_numbers = #tpu.dot_dimension_numbers<[1], [0], [0], [1], [0, 0, 1, 1], [], []>} : vector<16x32xf32>, vector<32x48xf32>, vector<16x48xf32> -> vector<16x48xf32>
    %7 = arith.mulf %2, %2 : vector<16x48xf32>
    %8 = arith.subf %4, %7 : vector<16x48xf32>
    %cst_6 = arith.constant 9.99999993E-9 : f32
    %9 = vector.broadcast %cst_6 : f32 to vector<16x48xf32>
    %10 = arith.maximumf %8, %9 : vector<16x48xf32>
    %11 = math.rsqrt %10 : vector<16x48xf32>
    %12 = arith.mulf %3, %11 : vector<16x48xf32>
    %13 = vector.broadcast %5 : vector<1x48xf32> to vector<16x48xf32>
    %14 = arith.mulf %2, %13 : vector<16x48xf32>
    %15 = arith.subf %6, %14 : vector<16x48xf32>
    %16 = arith.mulf %12, %15 : vector<16x48xf32>
    %17 = vector.extract_strided_slice %16 {offsets = [0, 0], sizes = [8, 48], strides = [1, 1]} : vector<16x48xf32> to vector<8x48xf32>
    %18 = tpu.iota {dimensions = array<i32: 0>} : vector<8x48xi32>
    %c1_i32 = arith.constant 1 : i32
    %19 = vector.broadcast %c1_i32 : i32 to vector<8x48xi32>
    %20 = arith.andi %18, %19 : vector<8x48xi32>
    %c0_i32 = arith.constant 0 : i32
    %21 = vector.broadcast %c0_i32 : i32 to vector<8x48xi32>
    %22 = arith.cmpi ne, %20, %21 : vector<8x48xi32>
    %c1_i32_7 = arith.constant 1 : i32
    %23 = tpu.dynamic_rotate %17 by %c1_i32_7 dim 0 : vector<8x48xf32>, i32 -> vector<8x48xf32>
    %c7_i32 = arith.constant 7 : i32
    %24 = tpu.dynamic_rotate %17 by %c7_i32 dim 0 : vector<8x48xf32>, i32 -> vector<8x48xf32>
    %25 = arith.select %22, %23, %24 : vector<8x48xi1>, vector<8x48xf32>
    %c3_i32 = arith.constant 3 : i32
    %26 = vector.broadcast %c3_i32 : i32 to vector<8x48xi32>
    %27 = arith.andi %18, %26 : vector<8x48xi32>
    %c0_i32_8 = arith.constant 0 : i32
    %28 = vector.broadcast %c0_i32_8 : i32 to vector<8x48xi32>
    %29 = arith.cmpi eq, %27, %28 : vector<8x48xi32>
    %c3_i32_9 = arith.constant 3 : i32
    %30 = vector.broadcast %c3_i32_9 : i32 to vector<8x48xi32>
    %31 = arith.cmpi eq, %27, %30 : vector<8x48xi32>
    %32 = arith.ori %29, %31 : vector<8x48xi1>
    %33 = arith.minimumf %17, %25 : vector<8x48xf32>
    %34 = arith.maximumf %17, %25 : vector<8x48xf32>
    %35 = arith.select %32, %33, %34 : vector<8x48xi1>, vector<8x48xf32>
    %c2_i32 = arith.constant 2 : i32
    %36 = vector.broadcast %c2_i32 : i32 to vector<8x48xi32>
    %37 = arith.andi %18, %36 : vector<8x48xi32>
    %c0_i32_10 = arith.constant 0 : i32
    %38 = vector.broadcast %c0_i32_10 : i32 to vector<8x48xi32>
    %39 = arith.cmpi ne, %37, %38 : vector<8x48xi32>
    %c2_i32_11 = arith.constant 2 : i32
    %40 = tpu.dynamic_rotate %35 by %c2_i32_11 dim 0 : vector<8x48xf32>, i32 -> vector<8x48xf32>
    %c6_i32 = arith.constant 6 : i32
    %41 = tpu.dynamic_rotate %35 by %c6_i32 dim 0 : vector<8x48xf32>, i32 -> vector<8x48xf32>
    %42 = arith.select %39, %40, %41 : vector<8x48xi1>, vector<8x48xf32>
    %c6_i32_12 = arith.constant 6 : i32
    %43 = vector.broadcast %c6_i32_12 : i32 to vector<8x48xi32>
    %44 = arith.andi %18, %43 : vector<8x48xi32>
    %c0_i32_13 = arith.constant 0 : i32
    %45 = vector.broadcast %c0_i32_13 : i32 to vector<8x48xi32>
    %46 = arith.cmpi eq, %44, %45 : vector<8x48xi32>
    %c6_i32_14 = arith.constant 6 : i32
    %47 = vector.broadcast %c6_i32_14 : i32 to vector<8x48xi32>
    %48 = arith.cmpi eq, %44, %47 : vector<8x48xi32>
    %49 = arith.ori %46, %48 : vector<8x48xi1>
    %50 = arith.minimumf %35, %42 : vector<8x48xf32>
    %51 = arith.maximumf %35, %42 : vector<8x48xf32>
    %52 = arith.select %49, %50, %51 : vector<8x48xi1>, vector<8x48xf32>
    %c1_i32_15 = arith.constant 1 : i32
    %53 = vector.broadcast %c1_i32_15 : i32 to vector<8x48xi32>
    %54 = arith.andi %18, %53 : vector<8x48xi32>
    %c0_i32_16 = arith.constant 0 : i32
    %55 = vector.broadcast %c0_i32_16 : i32 to vector<8x48xi32>
    %56 = arith.cmpi ne, %54, %55 : vector<8x48xi32>
    %c1_i32_17 = arith.constant 1 : i32
    %57 = tpu.dynamic_rotate %52 by %c1_i32_17 dim 0 : vector<8x48xf32>, i32 -> vector<8x48xf32>
    %c7_i32_18 = arith.constant 7 : i32
    %58 = tpu.dynamic_rotate %52 by %c7_i32_18 dim 0 : vector<8x48xf32>, i32 -> vector<8x48xf32>
    %59 = arith.select %56, %57, %58 : vector<8x48xi1>, vector<8x48xf32>
    %c5_i32 = arith.constant 5 : i32
    %60 = vector.broadcast %c5_i32 : i32 to vector<8x48xi32>
    %61 = arith.andi %18, %60 : vector<8x48xi32>
    %c0_i32_19 = arith.constant 0 : i32
    %62 = vector.broadcast %c0_i32_19 : i32 to vector<8x48xi32>
    %63 = arith.cmpi eq, %61, %62 : vector<8x48xi32>
    %c5_i32_20 = arith.constant 5 : i32
    %64 = vector.broadcast %c5_i32_20 : i32 to vector<8x48xi32>
    %65 = arith.cmpi eq, %61, %64 : vector<8x48xi32>
    %66 = arith.ori %63, %65 : vector<8x48xi1>
    %67 = arith.minimumf %52, %59 : vector<8x48xf32>
    %68 = arith.maximumf %52, %59 : vector<8x48xf32>
    %69 = arith.select %66, %67, %68 : vector<8x48xi1>, vector<8x48xf32>
    %c4_i32 = arith.constant 4 : i32
    %70 = tpu.dynamic_rotate %69 by %c4_i32 dim 0 : vector<8x48xf32>, i32 -> vector<8x48xf32>
    %c12_i32 = arith.constant 12 : i32
    %71 = vector.broadcast %c12_i32 : i32 to vector<8x48xi32>
    %72 = arith.andi %18, %71 : vector<8x48xi32>
    %c0_i32_21 = arith.constant 0 : i32
    %73 = vector.broadcast %c0_i32_21 : i32 to vector<8x48xi32>
    %74 = arith.cmpi eq, %72, %73 : vector<8x48xi32>
    %c12_i32_22 = arith.constant 12 : i32
    %75 = vector.broadcast %c12_i32_22 : i32 to vector<8x48xi32>
    %76 = arith.cmpi eq, %72, %75 : vector<8x48xi32>
    %77 = arith.ori %74, %76 : vector<8x48xi1>
    %78 = arith.minimumf %69, %70 : vector<8x48xf32>
    %79 = arith.maximumf %69, %70 : vector<8x48xf32>
    %80 = arith.select %77, %78, %79 : vector<8x48xi1>, vector<8x48xf32>
    %c2_i32_23 = arith.constant 2 : i32
    %81 = vector.broadcast %c2_i32_23 : i32 to vector<8x48xi32>
    %82 = arith.andi %18, %81 : vector<8x48xi32>
    %c0_i32_24 = arith.constant 0 : i32
    %83 = vector.broadcast %c0_i32_24 : i32 to vector<8x48xi32>
    %84 = arith.cmpi ne, %82, %83 : vector<8x48xi32>
    %c2_i32_25 = arith.constant 2 : i32
    %85 = tpu.dynamic_rotate %80 by %c2_i32_25 dim 0 : vector<8x48xf32>, i32 -> vector<8x48xf32>
    %c6_i32_26 = arith.constant 6 : i32
    %86 = tpu.dynamic_rotate %80 by %c6_i32_26 dim 0 : vector<8x48xf32>, i32 -> vector<8x48xf32>
    %87 = arith.select %84, %85, %86 : vector<8x48xi1>, vector<8x48xf32>
    %c10_i32 = arith.constant 10 : i32
    %88 = vector.broadcast %c10_i32 : i32 to vector<8x48xi32>
    %89 = arith.andi %18, %88 : vector<8x48xi32>
    %c0_i32_27 = arith.constant 0 : i32
    %90 = vector.broadcast %c0_i32_27 : i32 to vector<8x48xi32>
    %91 = arith.cmpi eq, %89, %90 : vector<8x48xi32>
    %c10_i32_28 = arith.constant 10 : i32
    %92 = vector.broadcast %c10_i32_28 : i32 to vector<8x48xi32>
    %93 = arith.cmpi eq, %89, %92 : vector<8x48xi32>
    %94 = arith.ori %91, %93 : vector<8x48xi1>
    %95 = arith.minimumf %80, %87 : vector<8x48xf32>
    %96 = arith.maximumf %80, %87 : vector<8x48xf32>
    %97 = arith.select %94, %95, %96 : vector<8x48xi1>, vector<8x48xf32>
    %c1_i32_29 = arith.constant 1 : i32
    %98 = vector.broadcast %c1_i32_29 : i32 to vector<8x48xi32>
    %99 = arith.andi %18, %98 : vector<8x48xi32>
    %c0_i32_30 = arith.constant 0 : i32
    %100 = vector.broadcast %c0_i32_30 : i32 to vector<8x48xi32>
    %101 = arith.cmpi ne, %99, %100 : vector<8x48xi32>
    %c1_i32_31 = arith.constant 1 : i32
    %102 = tpu.dynamic_rotate %97 by %c1_i32_31 dim 0 : vector<8x48xf32>, i32 -> vector<8x48xf32>
    %c7_i32_32 = arith.constant 7 : i32
    %103 = tpu.dynamic_rotate %97 by %c7_i32_32 dim 0 : vector<8x48xf32>, i32 -> vector<8x48xf32>
    %104 = arith.select %101, %102, %103 : vector<8x48xi1>, vector<8x48xf32>
    %c9_i32 = arith.constant 9 : i32
    %105 = vector.broadcast %c9_i32 : i32 to vector<8x48xi32>
    %106 = arith.andi %18, %105 : vector<8x48xi32>
    %c0_i32_33 = arith.constant 0 : i32
    %107 = vector.broadcast %c0_i32_33 : i32 to vector<8x48xi32>
    %108 = arith.cmpi eq, %106, %107 : vector<8x48xi32>
    %c9_i32_34 = arith.constant 9 : i32
    %109 = vector.broadcast %c9_i32_34 : i32 to vector<8x48xi32>
    %110 = arith.cmpi eq, %106, %109 : vector<8x48xi32>
    %111 = arith.ori %108, %110 : vector<8x48xi1>
    %112 = arith.minimumf %97, %104 : vector<8x48xf32>
    %113 = arith.maximumf %97, %104 : vector<8x48xf32>
    %114 = arith.select %111, %112, %113 : vector<8x48xi1>, vector<8x48xf32>
    %115 = vector.extract_strided_slice %16 {offsets = [8, 0], sizes = [8, 48], strides = [1, 1]} : vector<16x48xf32> to vector<8x48xf32>
    %116 = tpu.iota {dimensions = array<i32: 0>} : vector<8x48xi32>
    %c1_i32_35 = arith.constant 1 : i32
    %117 = vector.broadcast %c1_i32_35 : i32 to vector<8x48xi32>
    %118 = arith.andi %116, %117 : vector<8x48xi32>
    %c0_i32_36 = arith.constant 0 : i32
    %119 = vector.broadcast %c0_i32_36 : i32 to vector<8x48xi32>
    %120 = arith.cmpi ne, %118, %119 : vector<8x48xi32>
    %c1_i32_37 = arith.constant 1 : i32
    %121 = tpu.dynamic_rotate %115 by %c1_i32_37 dim 0 : vector<8x48xf32>, i32 -> vector<8x48xf32>
    %c7_i32_38 = arith.constant 7 : i32
    %122 = tpu.dynamic_rotate %115 by %c7_i32_38 dim 0 : vector<8x48xf32>, i32 -> vector<8x48xf32>
    %123 = arith.select %120, %121, %122 : vector<8x48xi1>, vector<8x48xf32>
    %c3_i32_39 = arith.constant 3 : i32
    %124 = vector.broadcast %c3_i32_39 : i32 to vector<8x48xi32>
    %125 = arith.andi %116, %124 : vector<8x48xi32>
    %c0_i32_40 = arith.constant 0 : i32
    %126 = vector.broadcast %c0_i32_40 : i32 to vector<8x48xi32>
    %127 = arith.cmpi eq, %125, %126 : vector<8x48xi32>
    %c3_i32_41 = arith.constant 3 : i32
    %128 = vector.broadcast %c3_i32_41 : i32 to vector<8x48xi32>
    %129 = arith.cmpi eq, %125, %128 : vector<8x48xi32>
    %130 = arith.ori %127, %129 : vector<8x48xi1>
    %131 = arith.minimumf %115, %123 : vector<8x48xf32>
    %132 = arith.maximumf %115, %123 : vector<8x48xf32>
    %133 = arith.select %130, %131, %132 : vector<8x48xi1>, vector<8x48xf32>
    %c2_i32_42 = arith.constant 2 : i32
    %134 = vector.broadcast %c2_i32_42 : i32 to vector<8x48xi32>
    %135 = arith.andi %116, %134 : vector<8x48xi32>
    %c0_i32_43 = arith.constant 0 : i32
    %136 = vector.broadcast %c0_i32_43 : i32 to vector<8x48xi32>
    %137 = arith.cmpi ne, %135, %136 : vector<8x48xi32>
    %c2_i32_44 = arith.constant 2 : i32
    %138 = tpu.dynamic_rotate %133 by %c2_i32_44 dim 0 : vector<8x48xf32>, i32 -> vector<8x48xf32>
    %c6_i32_45 = arith.constant 6 : i32
    %139 = tpu.dynamic_rotate %133 by %c6_i32_45 dim 0 : vector<8x48xf32>, i32 -> vector<8x48xf32>
    %140 = arith.select %137, %138, %139 : vector<8x48xi1>, vector<8x48xf32>
    %c6_i32_46 = arith.constant 6 : i32
    %141 = vector.broadcast %c6_i32_46 : i32 to vector<8x48xi32>
    %142 = arith.andi %116, %141 : vector<8x48xi32>
    %c0_i32_47 = arith.constant 0 : i32
    %143 = vector.broadcast %c0_i32_47 : i32 to vector<8x48xi32>
    %144 = arith.cmpi eq, %142, %143 : vector<8x48xi32>
    %c6_i32_48 = arith.constant 6 : i32
    %145 = vector.broadcast %c6_i32_48 : i32 to vector<8x48xi32>
    %146 = arith.cmpi eq, %142, %145 : vector<8x48xi32>
    %147 = arith.ori %144, %146 : vector<8x48xi1>
    %148 = arith.minimumf %133, %140 : vector<8x48xf32>
    %149 = arith.maximumf %133, %140 : vector<8x48xf32>
    %150 = arith.select %147, %148, %149 : vector<8x48xi1>, vector<8x48xf32>
    %c1_i32_49 = arith.constant 1 : i32
    %151 = vector.broadcast %c1_i32_49 : i32 to vector<8x48xi32>
    %152 = arith.andi %116, %151 : vector<8x48xi32>
    %c0_i32_50 = arith.constant 0 : i32
    %153 = vector.broadcast %c0_i32_50 : i32 to vector<8x48xi32>
    %154 = arith.cmpi ne, %152, %153 : vector<8x48xi32>
    %c1_i32_51 = arith.constant 1 : i32
    %155 = tpu.dynamic_rotate %150 by %c1_i32_51 dim 0 : vector<8x48xf32>, i32 -> vector<8x48xf32>
    %c7_i32_52 = arith.constant 7 : i32
    %156 = tpu.dynamic_rotate %150 by %c7_i32_52 dim 0 : vector<8x48xf32>, i32 -> vector<8x48xf32>
    %157 = arith.select %154, %155, %156 : vector<8x48xi1>, vector<8x48xf32>
    %c5_i32_53 = arith.constant 5 : i32
    %158 = vector.broadcast %c5_i32_53 : i32 to vector<8x48xi32>
    %159 = arith.andi %116, %158 : vector<8x48xi32>
    %c0_i32_54 = arith.constant 0 : i32
    %160 = vector.broadcast %c0_i32_54 : i32 to vector<8x48xi32>
    %161 = arith.cmpi eq, %159, %160 : vector<8x48xi32>
    %c5_i32_55 = arith.constant 5 : i32
    %162 = vector.broadcast %c5_i32_55 : i32 to vector<8x48xi32>
    %163 = arith.cmpi eq, %159, %162 : vector<8x48xi32>
    %164 = arith.ori %161, %163 : vector<8x48xi1>
    %165 = arith.minimumf %150, %157 : vector<8x48xf32>
    %166 = arith.maximumf %150, %157 : vector<8x48xf32>
    %167 = arith.select %164, %165, %166 : vector<8x48xi1>, vector<8x48xf32>
    %c4_i32_56 = arith.constant 4 : i32
    %168 = tpu.dynamic_rotate %167 by %c4_i32_56 dim 0 : vector<8x48xf32>, i32 -> vector<8x48xf32>
    %c12_i32_57 = arith.constant 12 : i32
    %169 = vector.broadcast %c12_i32_57 : i32 to vector<8x48xi32>
    %170 = arith.andi %116, %169 : vector<8x48xi32>
    %c0_i32_58 = arith.constant 0 : i32
    %171 = vector.broadcast %c0_i32_58 : i32 to vector<8x48xi32>
    %172 = arith.cmpi eq, %170, %171 : vector<8x48xi32>
    %c12_i32_59 = arith.constant 12 : i32
    %173 = vector.broadcast %c12_i32_59 : i32 to vector<8x48xi32>
    %174 = arith.cmpi eq, %170, %173 : vector<8x48xi32>
    %175 = arith.ori %172, %174 : vector<8x48xi1>
    %176 = arith.minimumf %167, %168 : vector<8x48xf32>
    %177 = arith.maximumf %167, %168 : vector<8x48xf32>
    %178 = arith.select %175, %176, %177 : vector<8x48xi1>, vector<8x48xf32>
    %c2_i32_60 = arith.constant 2 : i32
    %179 = vector.broadcast %c2_i32_60 : i32 to vector<8x48xi32>
    %180 = arith.andi %116, %179 : vector<8x48xi32>
    %c0_i32_61 = arith.constant 0 : i32
    %181 = vector.broadcast %c0_i32_61 : i32 to vector<8x48xi32>
    %182 = arith.cmpi ne, %180, %181 : vector<8x48xi32>
    %c2_i32_62 = arith.constant 2 : i32
    %183 = tpu.dynamic_rotate %178 by %c2_i32_62 dim 0 : vector<8x48xf32>, i32 -> vector<8x48xf32>
    %c6_i32_63 = arith.constant 6 : i32
    %184 = tpu.dynamic_rotate %178 by %c6_i32_63 dim 0 : vector<8x48xf32>, i32 -> vector<8x48xf32>
    %185 = arith.select %182, %183, %184 : vector<8x48xi1>, vector<8x48xf32>
    %c10_i32_64 = arith.constant 10 : i32
    %186 = vector.broadcast %c10_i32_64 : i32 to vector<8x48xi32>
    %187 = arith.andi %116, %186 : vector<8x48xi32>
    %c0_i32_65 = arith.constant 0 : i32
    %188 = vector.broadcast %c0_i32_65 : i32 to vector<8x48xi32>
    %189 = arith.cmpi eq, %187, %188 : vector<8x48xi32>
    %c10_i32_66 = arith.constant 10 : i32
    %190 = vector.broadcast %c10_i32_66 : i32 to vector<8x48xi32>
    %191 = arith.cmpi eq, %187, %190 : vector<8x48xi32>
    %192 = arith.ori %189, %191 : vector<8x48xi1>
    %193 = arith.minimumf %178, %185 : vector<8x48xf32>
    %194 = arith.maximumf %178, %185 : vector<8x48xf32>
    %195 = arith.select %192, %193, %194 : vector<8x48xi1>, vector<8x48xf32>
    %c1_i32_67 = arith.constant 1 : i32
    %196 = vector.broadcast %c1_i32_67 : i32 to vector<8x48xi32>
    %197 = arith.andi %116, %196 : vector<8x48xi32>
    %c0_i32_68 = arith.constant 0 : i32
    %198 = vector.broadcast %c0_i32_68 : i32 to vector<8x48xi32>
    %199 = arith.cmpi ne, %197, %198 : vector<8x48xi32>
    %c1_i32_69 = arith.constant 1 : i32
    %200 = tpu.dynamic_rotate %195 by %c1_i32_69 dim 0 : vector<8x48xf32>, i32 -> vector<8x48xf32>
    %c7_i32_70 = arith.constant 7 : i32
    %201 = tpu.dynamic_rotate %195 by %c7_i32_70 dim 0 : vector<8x48xf32>, i32 -> vector<8x48xf32>
    %202 = arith.select %199, %200, %201 : vector<8x48xi1>, vector<8x48xf32>
    %c9_i32_71 = arith.constant 9 : i32
    %203 = vector.broadcast %c9_i32_71 : i32 to vector<8x48xi32>
    %204 = arith.andi %116, %203 : vector<8x48xi32>
    %c0_i32_72 = arith.constant 0 : i32
    %205 = vector.broadcast %c0_i32_72 : i32 to vector<8x48xi32>
    %206 = arith.cmpi eq, %204, %205 : vector<8x48xi32>
    %c9_i32_73 = arith.constant 9 : i32
    %207 = vector.broadcast %c9_i32_73 : i32 to vector<8x48xi32>
    %208 = arith.cmpi eq, %204, %207 : vector<8x48xi32>
    %209 = arith.ori %206, %208 : vector<8x48xi1>
    %210 = arith.minimumf %195, %202 : vector<8x48xf32>
    %211 = arith.maximumf %195, %202 : vector<8x48xf32>
    %212 = arith.select %209, %210, %211 : vector<8x48xi1>, vector<8x48xf32>
    %213 = arith.subf %114, %212 : vector<8x48xf32>
    %214 = arith.mulf %213, %213 : vector<8x48xf32>
    %cst_74 = arith.constant dense<0.000000e+00> : vector<8xf32>
    %215 = vector.multi_reduction <add>, %214, %cst_74 [1] : vector<8x48xf32> to vector<8xf32>
    %216 = vector.shape_cast %215 : vector<8xf32> to vector<8x1xf32>
    %cst_75 = arith.constant dense<0.000000e+00> : vector<1xf32>
    %217 = vector.multi_reduction <add>, %216, %cst_75 [0] : vector<8x1xf32> to vector<1xf32>
    %218 = vector.shape_cast %217 : vector<1xf32> to vector<1x1xf32>
    %cst_76 = arith.constant 0.00260416674 : f32
    %219 = vector.broadcast %cst_76 : f32 to vector<1x1xf32>
    %220 = arith.mulf %218, %219 : vector<1x1xf32>
    %c0_77 = arith.constant 0 : index
    %c0_78 = arith.constant 0 : index
    %221 = vector.load %arg1[%c0_77, %c0_78] : memref<1x1xf32, #tpu.memory_space<vmem>>, vector<1x1xf32>
    tpu.vector_store %arg1[%c0_77, %c0_78], %220 {strides = array<i32>} : memref<1x1xf32, #tpu.memory_space<vmem>>, vector<1x1xf32>,
    return
  }
}

</mosaic_0001>

<bundles_post_ra>
// kernel: representation_tangent_collapse.1
= control target key start
LH: loop header
LB: loop body
LE: loop exit
PB: predicated region body
PF: predicated region fallthrough
CT: control target
= control target key end

     0   :  { %s375_s0 = inlined_call_operand.vmem [shape: f32[97,48], index: 0, kind: input, shape index: {}]   ;;  %s376_s1 = inlined_call_operand.hbm [shape: f32[1,1], index: 1, kind: output, shape index: {}]  }
   0x1   :  { %v12_v0 = vld [vmem:[%s375_s0 + $0x18] sm:$0xff]  ;;  %v11_v1 = vld [vmem:[%s375_s0 + $0x10] sm:$0xff]  ;;  %v10_v2 = vld [vmem:[%s375_s0 + $0x8] sm:$0xff] }
   0x2   :  { %41 = vmatpush.msra.mxu0 %v12_v0  ;;  %218 = vmatpush.msra.mxu1 %v12_v0 }
   0x4   :  { %42 = vmatpush.msra.mxu0 %v11_v1  ;;  %219 = vmatpush.msra.mxu1 %v11_v1 }
   0x5   :  { %6 = vsyncpa [#allocation3], 0  ;;  %v9_v3 = vld [vmem:[%s375_s0] sm:$0xff]  ;;  %vm22_vm0 = vcmask 261120   ;;  %v14_v5 = vld [vmem:[%s375_s0 + $0x28] sm:$0xff]  ;;  %v87_v27 = vlaneseq  ;;  %s207_s6 = sshll.u32 %s376_s1, 4  ;;  %s208_s6 = int_to_ptr.hbm [resolvable:$true] %s207_s6 }
   0x6   :  { %43 = vmatpush.msra.mxu0 %v10_v2  ;;  %220 = vmatpush.msra.mxu1 %v10_v2  ;;  %v13_v4 = vld [vmem:[%s375_s0 + $0x20] sm:$0xff]  ;;  %v15_v6 = vld [vmem:[%s375_s0 + $0x30] sm:$0xff]  ;;  %v16_v7 = vld [vmem:[%s375_s0 + $0x38] sm:$0xff] }
   0x7   :  { %v52_v8 = vmul.f32 %v15_v6, %v15_v6  ;;  %v19_v9 = vld [vmem:[%s375_s0 + $0x50] sm:$0xff]  ;;  %v53_v10 = vmul.f32 %v16_v7, %v16_v7  ;;  %v20_v11 = vld [vmem:[%s375_s0 + $0x58] sm:$0xff]  ;;  %v223_v29 = vld [vmem:[%s375_s0 + $0x60] ss:$0 sm:$0xff]  ;;  %v301_v32 = vshrl.u32 %v87_v27, 7 }
   0x8   :  { %44 = vmatpush.msra.mxu0 %v9_v3  ;;  %221 = vmatpush.msra.mxu1 %v9_v3  ;;  %v17_v30 = vld [vmem:[%s375_s0 + $0x40] sm:$0xff]  ;;  %v18_v33 = vld [vmem:[%s375_s0 + $0x48] sm:$0xff]  ;;  %v81_v35 = vmul.f32 %v223_v29, %v15_v6  ;;  %v82_v36 = vmul.f32 %v223_v29, %v16_v7  ;;  %s254_s0 = smov [#allocation2]  }
   0x9   :  { %216 = vmatmul.msk.f32.vlgmr.msra.gmra.mxu0 %vm22_vm0, %v13_v4  ;;  %217 = vmatmul.msk.f32.vlgmr.msra.gmra.mxu1 %vm22_vm0, %v14_v5  ;;  %v54_v12 = vsub.f32 %v19_v9, %v52_v8  ;;  %v55_v13 = vsub.f32 %v20_v11, %v53_v10  ;;  %v89_v40 = vand.u32 1, %v301_v32  ;;  %v94_v41 = vand.u32 3, %v301_v32  ;;  %s205_s3 = sshll.u32 %s254_s0, 4  ;;  %s206_s3 = int_to_ptr.vmem [resolvable:$true] %s205_s3 }
   0xa   :  { %v101_v50 = vand.u32 2, %v301_v32  ;;  %v106_v55 = vand.u32 6, %v301_v32  ;;  %v116_v7 = vand.u32 5, %v301_v32 }
   0xb   :  { %v56_v14 = vmax.f32 %v54_v12, 1e-08  ;;  %v57_v15 = vmax.f32 %v55_v13, 1e-08  ;;  %vm308_vm7 = vcmp.ne.s32.totalorder %v89_v40, 0  ;;  %vm312_vm8 = vcmp.eq.s32.totalorder %v94_v41, 0 }
   0xc   :  { %vm316_vm9 = vcmp.eq.s32.totalorder %v94_v41, 3  ;;  %vm330_vm11 = vcmp.ne.s32.totalorder %v101_v50, 0  ;;  %vm334_vm12 = vcmp.eq.s32.totalorder %v106_v55, 0  ;;  %vm338_vm13 = vcmp.eq.s32.totalorder %v106_v55, 6 }
   0xd   :  { %224 = vrsqrt.f32 %v56_v14  ;;  %vm64_vm1 = vweird.f32 %v56_v14  ;;  %vm74_vm3 = vweird.f32 %v57_v15  ;;  %vm97_vm10 = vmor %vm312_vm8, %vm316_vm9  ;;  %vm351_vm15 = vcmp.eq.s32.totalorder %v116_v7, 0 }
   0xe   :  { %226 = vrsqrt.f32 %v57_v15  ;;  %vm109_vm14 = vmor %vm334_vm12, %vm338_vm13  ;;  %vm118_vm0 = vcmp.eq.s32.totalorder %v116_v7, 5 }
  0x13   :  { %v225_v16 = vpop.eup %224 }
  0x14   :  { %v227_v17 = vpop.eup %226  ;;  %v59_v18 = vmul.f32 %v225_v16, %v56_v14  ;;  %vm65_vm2 = vweird.f32 %v225_v16 }
  0x15   :  { %v69_v19 = vmul.f32 %v227_v17, %v57_v15  ;;  %vm75_vm4 = vweird.f32 %v227_v17  ;;  %vm66_vm5 = vmor %vm64_vm1, %vm65_vm2 }
  0x16   :  { %v60_v20 = vmul.f32 %v225_v16, %v59_v18  ;;  %vm76_vm6 = vmor %vm74_vm3, %vm75_vm4 }
  0x17   :  { %v70_v21 = vmul.f32 %v227_v17, %v69_v19  ;;  %vm119_vm1 = vmor %vm351_vm15, %vm118_vm0 }
  0x18   :  { %v61_v22 = vmul.f32 0.5, %v60_v20 }
  0x19   :  { %v71_v23 = vmul.f32 0.5, %v70_v21 }
  0x1a   :  { %v62_v24 = vsub.f32 1.5, %v61_v22 }
  0x1b   :  { %v72_v25 = vsub.f32 1.5, %v71_v23  ;;  %v124_v23 = vand.u32 12, %v301_v32 }
  0x1c   :  { %v63_v26 = vmul.f32 %v225_v16, %v62_v24 }
  0x1d   :  { %v73_v28 = vmul.f32 %v227_v17, %v72_v25  ;;  %vm125_vm2 = vcmp.eq.s32.totalorder %v124_v23, 0 }
  0x1e   :  { %v67_v31 = vsel %vm66_vm5, %v225_v16, %v63_v26  ;;  %vm187_vm5 = vcmask 392192  }
  0x1f   :  { %v77_v34 = vsel %vm76_vm6, %v227_v17, %v73_v28  ;;  %v78_v37 = vmul.f32 %v67_v31, %v17_v30  ;;  %vm198_vm6 = vcmask 0  }
  0x20   :  { %v79_v38 = vmul.f32 %v77_v34, %v18_v33 }
  0x86   :  { %v46_v39 = vpop.f32.mrf.mxu0  ;;  %v49_v42 = vpop.f32.mrf.mxu1 }
  0x87   :  { %v83_v43 = vsub.f32 %v46_v39, %v81_v35  ;;  %v84_v44 = vsub.f32 %v49_v42, %v82_v36 }
  0x89   :  { %v85_v45 = vmul.f32 %v83_v43, %v78_v37  ;;  %v86_v46 = vmul.f32 %v84_v44, %v79_v38  ;;  %v134_v37 = vand.u32 10, %v301_v32 }
  0x8b   :  { %v91_v51 = vrot.slane %v85_v45, 7  ;;  %v92_v52 = vrot.slane %v85_v45, 1  ;;  %v151_v53 = vrot.slane %v86_v46, 7  ;;  %v152_v54 = vrot.slane %v86_v46, 1 }
  0x8c   :  { %vm135_vm3 = vcmp.eq.s32.totalorder %v134_v37, 0 }
  0x8d   :  { %v93_v56 = vsel %vm308_vm7, %v91_v51, %v92_v52  ;;  %v153_v57 = vsel %vm308_vm7, %v151_v53, %v152_v54  ;;  %v144_v51 = vand.u32 9, %v301_v32 }
  0x8e   :  { %v98_v58 = vmin.f32 %v85_v45, %v93_v56  ;;  %v99_v59 = vmax.f32 %v85_v45, %v93_v56  ;;  %v154_v60 = vmin.f32 %v86_v46, %v153_v57  ;;  %v155_v61 = vmax.f32 %v86_v46, %v153_v57 }
  0x8f   :  { %vm145_vm4 = vcmp.eq.s32.totalorder %v144_v51, 0 }
  0x90   :  { %v100_v63 = vsel %vm97_vm10, %v98_v58, %v99_v59  ;;  %v156_v2 = vsel %vm97_vm10, %v154_v60, %v155_v61 }
  0x91   :  { %v103_v3 = vrot.slane %v100_v63, 6  ;;  %v104_v4 = vrot.slane %v100_v63, 2  ;;  %v157_v5 = vrot.slane %v156_v2, 6  ;;  %v158_v6 = vrot.slane %v156_v2, 2 }
  0x93   :  { %v105_v8 = vsel %vm330_vm11, %v103_v3, %v104_v4  ;;  %v159_v9 = vsel %vm330_vm11, %v157_v5, %v158_v6 }
  0x94   :  { %v110_v10 = vmin.f32 %v100_v63, %v105_v8  ;;  %v111_v11 = vmax.f32 %v100_v63, %v105_v8  ;;  %v160_v12 = vmin.f32 %v156_v2, %v159_v9  ;;  %v161_v13 = vmax.f32 %v156_v2, %v159_v9 }
  0x96   :  { %v112_v14 = vsel %vm109_vm14, %v110_v10, %v111_v11  ;;  %v162_v15 = vsel %vm109_vm14, %v160_v12, %v161_v13 }
  0x97   :  { %v113_v17 = vrot.slane %v112_v14, 7  ;;  %v114_v18 = vrot.slane %v112_v14, 1  ;;  %v163_v19 = vrot.slane %v162_v15, 7  ;;  %v164_v20 = vrot.slane %v162_v15, 1 }
  0x99   :  { %v115_v21 = vsel %vm308_vm7, %v113_v17, %v114_v18  ;;  %v165_v22 = vsel %vm308_vm7, %v163_v19, %v164_v20 }
  0x9a   :  { %v120_v24 = vmin.f32 %v112_v14, %v115_v21  ;;  %v121_v25 = vmax.f32 %v112_v14, %v115_v21  ;;  %v166_v26 = vmin.f32 %v162_v15, %v165_v22  ;;  %v167_v27 = vmax.f32 %v162_v15, %v165_v22 }
  0x9c   :  { %v122_v28 = vsel %vm119_vm1, %v120_v24, %v121_v25  ;;  %v168_v29 = vsel %vm119_vm1, %v166_v26, %v167_v27 }
  0x9d   :  { %v123_v30 = vrot.slane %v122_v28, 4  ;;  %v169_v31 = vrot.slane %v168_v29, 4 }
  0x9f   :  { %v128_v33 = vmin.f32 %v122_v28, %v123_v30  ;;  %v129_v34 = vmax.f32 %v122_v28, %v123_v30  ;;  %v170_v35 = vmin.f32 %v168_v29, %v169_v31  ;;  %v171_v36 = vmax.f32 %v168_v29, %v169_v31 }
  0xa1   :  { %v130_v38 = vsel %vm125_vm2, %v128_v33, %v129_v34  ;;  %v172_v39 = vsel %vm125_vm2, %v170_v35, %v171_v36 }
  0xa2   :  { %v131_v40 = vrot.slane %v130_v38, 6  ;;  %v132_v41 = vrot.slane %v130_v38, 2  ;;  %v173_v42 = vrot.slane %v172_v39, 6  ;;  %v174_v43 = vrot.slane %v172_v39, 2 }
  0xa4   :  { %v133_v44 = vsel %vm330_vm11, %v131_v40, %v132_v41  ;;  %v175_v45 = vsel %vm330_vm11, %v173_v42, %v174_v43 }
  0xa5   :  { %v138_v46 = vmin.f32 %v130_v38, %v133_v44  ;;  %v139_v48 = vmax.f32 %v130_v38, %v133_v44  ;;  %v176_v49 = vmin.f32 %v172_v39, %v175_v45  ;;  %v177_v50 = vmax.f32 %v172_v39, %v175_v45 }
  0xa7   :  { %v140_v52 = vsel %vm135_vm3, %v138_v46, %v139_v48  ;;  %v178_v53 = vsel %vm135_vm3, %v176_v49, %v177_v50 }
  0xa8   :  { %v141_v54 = vrot.slane %v140_v52, 7  ;;  %v142_v55 = vrot.slane %v140_v52, 1  ;;  %v179_v56 = vrot.slane %v178_v53, 7  ;;  %v180_v57 = vrot.slane %v178_v53, 1 }
  0xaa   :  { %v143_v58 = vsel %vm308_vm7, %v141_v54, %v142_v55  ;;  %v181_v59 = vsel %vm308_vm7, %v179_v56, %v180_v57 }
  0xab   :  { %v148_v60 = vmin.f32 %v140_v52, %v143_v58  ;;  %v149_v61 = vmax.f32 %v140_v52, %v143_v58  ;;  %v182_v62 = vmin.f32 %v178_v53, %v181_v59  ;;  %v183_v63 = vmax.f32 %v178_v53, %v181_v59 }
  0xad   :  { %v150_v0 = vsel %vm145_vm4, %v148_v60, %v149_v61  ;;  %v184_v1 = vsel %vm145_vm4, %v182_v62, %v183_v63 }
  0xae   :  { %v185_v32 = vsub.f32 %v150_v0, %v184_v1 }
  0xb0   :  { %v186_v2 = vmul.f32 %v185_v32, %v185_v32 }
  0xb2   :  { %v188_v3 = vsel %vm187_vm5, %v186_v2, 0.0 }
  0xb3   :  { %189 = vadd.xlane.f32.xlu0 %v188_v3 }
 0x126   :  { %v190_v4 = vpop.xlane.xlu0 %189 }
 0x127   :  { %v191_v5 = vrot.slane %v190_v4, 4 }
 0x129   :  { %v192_v6 = vadd.f32 %v191_v5, %v190_v4 }
 0x12b   :  { %v193_v7 = vrot.slane %v192_v6, 2 }
 0x12d   :  { %v194_v8 = vadd.f32 %v193_v7, %v192_v6 }
 0x12f   :  { %v195_v9 = vrot.slane %v194_v8, 1 }
 0x131   :  { %v196_v47 = vadd.f32 %v195_v9, %v194_v8 }
 0x133   :  { %v197_v10 = vmul.f32 0.0026041667, %v196_v47 }
 0x135   :  { %199 = vst.msk [vmem:[#allocation2] sm:$0x1] %vm198_vm6, %v197_v10 }
 0x136   :  { %210 = dma.vmem_to_hbm [thread:$0]  %s206_s3, 16, %s208_s6, [#allocation3]  }
 0x137   :  { %252 = dma.done.wait [#allocation3], 16  }
 0x138   :  { %253 = vsyncadd [#allocation3], 4294967280 }
 0x139   :  { %215 = vsyncpa [#allocation3], 1 }

</bundles_post_ra>
